<compile_context>
chip_gen: v7x
topology: tpu7x:2x2x1
jax: 0.10.0
libtpu: 0.0.40
codegen_flags: <defaults>
</compile_context>

<pallas_src>
import functools

import jax
import jax.numpy as jnp
from jax.experimental import pallas as pl
from jax.experimental.pallas import tpu as pltpu


def _round_up(x, m):
    return ((x + m - 1) // m) * m


def _softplus(x):
    # Numerically-stable softplus matching torch.nn.Softplus (beta=1, threshold=20)
    return jnp.where(x > 20.0, x, jnp.log1p(jnp.exp(jnp.minimum(x, 20.0))))


def _sigmoid(x):
    # tanh form: single EUP op + cheap VPU mul/add (vs exp + reciprocal)
    return 0.5 * (jnp.tanh(0.5 * x) + 1.0)


def decoder_kernel(z_ref, w1_ref, b1_ref, w2_ref, b2_ref, out_ref):
    z = z_ref[...]                                                    # [TILE_B, z_dim]
    # fc1 + softplus (f32 accumulation on the MXU)
    h = jnp.dot(z, w1_ref[...], preferred_element_type=jnp.float32)  # [TILE_B, hidden_p]
    h = _softplus(h + b1_ref[...])
    # fc21 + sigmoid
    o = jnp.dot(h, w2_ref[...], preferred_element_type=jnp.float32)  # [TILE_B, out_p]
    o = o + b2_ref[...]
    out_ref[...] = _sigmoid(o).astype(out_ref.dtype)


@functools.partial(jax.jit, static_argnames=("tile_b",))
def decoder_forward(z, w1, b1, w2, b2, *, tile_b=256):
    """z: [B, z_dim]; w1: [z_dim, hidden]; b1: [hidden];
    w2: [hidden, 784]; b2: [784]  ->  [B, 784]  (weights pre-transposed
    relative to nn.Linear, i.e. stored as [in_features, out_features])."""
    B, z_dim = z.shape
    hidden = w1.shape[1]
    out_dim = w2.shape[1]

    # Lane-dense padded feature dims (multiples of 128).
    hidden_p = _round_up(hidden, 128)
    out_p = _round_up(out_dim, 128)

    f32 = jnp.float32
    # Zero-pad parameters: padded b1 lanes = 0 and padded W2 rows = 0 keep the
    # math exact (softplus(0) in ghost hidden lanes multiplies a zero W2 row).
    w1p = jnp.zeros((z_dim, hidden_p), f32).at[:, :hidden].set(w1.astype(f32))
    b1p = jnp.zeros((1, hidden_p), f32).at[0, :hidden].set(b1.reshape(-1).astype(f32))
    w2p = jnp.zeros((hidden_p, out_p), f32).at[:hidden, :out_dim].set(w2.astype(f32))
    b2p = jnp.zeros((1, out_p), f32).at[0, :out_dim].set(b2.reshape(-1).astype(f32))

    # Batch tiling (sublane-aligned, padded so the grid divides evenly).
    tile_b = max(8, min(tile_b, _round_up(B, 8)))
    B_p = _round_up(B, tile_b)
    z_p = z.astype(f32)
    if B_p != B:
        z_p = jnp.zeros((B_p, z_dim), f32).at[:B, :].set(z_p)

    grid = (B_p // tile_b,)

    cost = pl.CostEstimate(
        flops=2 * B_p * (z_dim * hidden_p + hidden_p * out_p),
        transcendentals=B_p * (hidden_p + out_p),
        bytes_accessed=4 * (B_p * z_dim + z_dim * hidden_p + hidden_p
                            + hidden_p * out_p + out_p + B_p * out_p),
    )

    out_padded = pl.pallas_call(
        decoder_kernel,
        out_shape=jax.ShapeDtypeStruct((B_p, out_p), f32),
        grid_spec=pltpu.PrefetchScalarGridSpec(
            num_scalar_prefetch=0,
            grid=grid,
            in_specs=[
                pl.BlockSpec((tile_b, z_dim), lambda i: (i, 0)),      # streamed per tile
                pl.BlockSpec((z_dim, hidden_p), lambda i: (0, 0)),    # resident
                pl.BlockSpec((1, hidden_p), lambda i: (0, 0)),        # resident
                pl.BlockSpec((hidden_p, out_p), lambda i: (0, 0)),    # resident
                pl.BlockSpec((1, out_p), lambda i: (0, 0)),           # resident
            ],
            out_specs=pl.BlockSpec((tile_b, out_p), lambda i: (i, 0)),
        ),
        compiler_params=pltpu.CompilerParams(
            dimension_semantics=("parallel",),
        ),
        cost_estimate=cost,
    )(z_p, w1p, b1p, w2p, b2p)

    return out_padded[:B, :out_dim]


if __name__ == "__main__":
    # Small, decoder-consistent shapes: z_dim=32, hidden_dim=64, output=784 (28x28)
    B, z_dim, hidden_dim, out_dim = 8, 32, 64, 784

    key = jax.random.PRNGKey(0)
    k_z, k_w1, k_b1, k_w2, k_b2 = jax.random.split(key, 5)

    z = jax.random.normal(k_z, (B, z_dim), dtype=jnp.float32)

    # Deterministic parameter init (Kaiming-uniform-like scale, as nn.Linear),
    # stored pre-transposed as [in_features, out_features].
    lim1 = 1.0 / (z_dim ** 0.5)
    w1 = jax.random.uniform(k_w1, (z_dim, hidden_dim), jnp.float32, -lim1, lim1)
    b1 = jax.random.uniform(k_b1, (hidden_dim,), jnp.float32, -lim1, lim1)

    lim2 = 1.0 / (hidden_dim ** 0.5)
    w2 = jax.random.uniform(k_w2, (hidden_dim, out_dim), jnp.float32, -lim2, lim2)
    b2 = jax.random.uniform(k_b2, (out_dim,), jnp.float32, -lim2, lim2)

    out = decoder_forward(z, w1, b1, w2, b2)
    out = jax.block_until_ready(out)

    # Reference check in plain JAX
    h_ref = jax.nn.softplus(z @ w1 + b1[None, :])
    ref = jax.nn.sigmoid(h_ref @ w2 + b2[None, :])
    assert out.shape == (B, out_dim)
    assert jnp.allclose(out, ref, atol=1e-5, rtol=1e-5)

    print("KERNEL_OK")
</pallas_src>

<mosaic_0001>
module attributes {stable_mosaic.version = 11 : i64} {
  func.func @decoder_kernel(%arg0: i32, %arg1: memref<8x32xf32, #tpu.memory_space<vmem>>, %arg2: memref<32x128xf32, #tpu.memory_space<vmem>>, %arg3: memref<1x128xf32, #tpu.memory_space<vmem>>, %arg4: memref<128x896xf32, #tpu.memory_space<vmem>>, %arg5: memref<1x896xf32, #tpu.memory_space<vmem>>, %arg6: memref<8x896xf32, #tpu.memory_space<vmem>>) attributes {dimension_semantics = [#tpu.dimension_semantics<parallel>], iteration_bounds = array<i64: 1>, scalar_prefetch = 0 : i64, scratch_operands = 0 : i64, tpu.core_type = #tpu.core_type<tc>, window_params = [{transform_indices = @transform_0, window_bounds = array<i64: 8, 32>}, {pipeline_mode = #tpu.pipeline_mode<synchronous>, transform_indices = @transform_1, window_bounds = array<i64: 32, 128>}, {pipeline_mode = #tpu.pipeline_mode<synchronous>, transform_indices = @transform_2, window_bounds = array<i64: 1, 128>}, {pipeline_mode = #tpu.pipeline_mode<synchronous>, transform_indices = @transform_3, window_bounds = array<i64: 128, 896>}, {pipeline_mode = #tpu.pipeline_mode<synchronous>, transform_indices = @transform_4, window_bounds = array<i64: 1, 896>}, {transform_indices = @transform_5, window_bounds = array<i64: 8, 896>}]} {
    %c0 = arith.constant 0 : index
    %c0_0 = arith.constant 0 : index
    %0 = vector.load %arg1[%c0, %c0_0] : memref<8x32xf32, #tpu.memory_space<vmem>>, vector<8x32xf32>
    %c0_1 = arith.constant 0 : index
    %c0_2 = arith.constant 0 : index
    %1 = vector.load %arg2[%c0_1, %c0_2] : memref<32x128xf32, #tpu.memory_space<vmem>>, vector<32x128xf32>
    %cst = arith.constant dense<0.000000e+00> : vector<8x128xf32>
    %2 = tpu.matmul %0, %1, %cst {dimension_numbers = #tpu.dot_dimension_numbers<[1], [0], [0], [1], [0, 0, 1, 1], [], []>} : vector<8x32xf32>, vector<32x128xf32>, vector<8x128xf32> -> vector<8x128xf32>
    %c0_3 = arith.constant 0 : index
    %c0_4 = arith.constant 0 : index
    %3 = vector.load %arg3[%c0_3, %c0_4] : memref<1x128xf32, #tpu.memory_space<vmem>>, vector<1x128xf32>
    %4 = vector.broadcast %3 : vector<1x128xf32> to vector<8x128xf32>
    %5 = arith.addf %2, %4 : vector<8x128xf32>
    %cst_5 = arith.constant 2.000000e+01 : f32
    %6 = vector.broadcast %cst_5 : f32 to vector<8x128xf32>
    %7 = arith.cmpf ogt, %5, %6 : vector<8x128xf32>
    %cst_6 = arith.constant 2.000000e+01 : f32
    %8 = vector.broadcast %cst_6 : f32 to vector<8x128xf32>
    %9 = arith.minimumf %5, %8 : vector<8x128xf32>
    %10 = math.exp %9 : vector<8x128xf32>
    %11 = math.log1p %10 : vector<8x128xf32>
    %12 = arith.select %7, %5, %11 : vector<8x128xi1>, vector<8x128xf32>
    %c0_7 = arith.constant 0 : index
    %c0_8 = arith.constant 0 : index
    %13 = vector.load %arg4[%c0_7, %c0_8] : memref<128x896xf32, #tpu.memory_space<vmem>>, vector<128x896xf32>
    %cst_9 = arith.constant dense<0.000000e+00> : vector<8x896xf32>
    %14 = tpu.matmul %12, %13, %cst_9 {dimension_numbers = #tpu.dot_dimension_numbers<[1], [0], [0], [1], [0, 0, 1, 1], [], []>} : vector<8x128xf32>, vector<128x896xf32>, vector<8x896xf32> -> vector<8x896xf32>
    %c0_10 = arith.constant 0 : index
    %c0_11 = arith.constant 0 : index
    %15 = vector.load %arg5[%c0_10, %c0_11] : memref<1x896xf32, #tpu.memory_space<vmem>>, vector<1x896xf32>
    %16 = vector.broadcast %15 : vector<1x896xf32> to vector<8x896xf32>
    %17 = arith.addf %14, %16 : vector<8x896xf32>
    %cst_12 = arith.constant 5.000000e-01 : f32
    %18 = vector.broadcast %cst_12 : f32 to vector<8x896xf32>
    %19 = arith.mulf %18, %17 : vector<8x896xf32>
    %20 = math.tanh %19 : vector<8x896xf32>
    %cst_13 = arith.constant 1.000000e+00 : f32
    %21 = vector.broadcast %cst_13 : f32 to vector<8x896xf32>
    %22 = arith.addf %20, %21 : vector<8x896xf32>
    %cst_14 = arith.constant 5.000000e-01 : f32
    %23 = vector.broadcast %cst_14 : f32 to vector<8x896xf32>
    %24 = arith.mulf %23, %22 : vector<8x896xf32>
    %c0_15 = arith.constant 0 : index
    %c0_16 = arith.constant 0 : index
    %25 = vector.load %arg6[%c0_15, %c0_16] : memref<8x896xf32, #tpu.memory_space<vmem>>, vector<8x896xf32>
    tpu.vector_store %arg6[%c0_15, %c0_16], %24 {strides = array<i32>} : memref<8x896xf32, #tpu.memory_space<vmem>>, vector<8x896xf32>,
    return
  }
  func.func @transform_0(%arg0: i32) -> (i32, i32) {
    %c0_i32 = arith.constant 0 : i32
    %c0_i32_0 = arith.constant 0 : i32
    return %arg0, %c0_i32 : i32, i32
  }
  func.func @transform_1(%arg0: i32) -> (i32, i32) {
    %c0_i32 = arith.constant 0 : i32
    %c0_i32_0 = arith.constant 0 : i32
    %c0_i32_1 = arith.constant 0 : i32
    return %c0_i32, %c0_i32_0 : i32, i32
  }
  func.func @transform_2(%arg0: i32) -> (i32, i32) {
    %c0_i32 = arith.constant 0 : i32
    %c0_i32_0 = arith.constant 0 : i32
    %c0_i32_1 = arith.constant 0 : i32
    return %c0_i32, %c0_i32_0 : i32, i32
  }
  func.func @transform_3(%arg0: i32) -> (i32, i32) {
    %c0_i32 = arith.constant 0 : i32
    %c0_i32_0 = arith.constant 0 : i32
    %c0_i32_1 = arith.constant 0 : i32
    return %c0_i32, %c0_i32_0 : i32, i32
  }
  func.func @transform_4(%arg0: i32) -> (i32, i32) {
    %c0_i32 = arith.constant 0 : i32
    %c0_i32_0 = arith.constant 0 : i32
    %c0_i32_1 = arith.constant 0 : i32
    return %c0_i32, %c0_i32_0 : i32, i32
  }
  func.func @transform_5(%arg0: i32) -> (i32, i32) {
    %c0_i32 = arith.constant 0 : i32
    %c0_i32_0 = arith.constant 0 : i32
    return %arg0, %c0_i32 : i32, i32
  }
}

</mosaic_0001>

<bundles_post_ra>
// kernel: decoder_forward.1
= control target key start
LH: loop header
LB: loop body
LE: loop exit
PB: predicated region body
PF: predicated region fallthrough
CT: control target
= control target key end

     0   :  { %v844_v3 = vmov 0.0|0.0   ;;  %vm845_vm0 = vmmov 0   ;;  %v846_v6 = vmov 0.0   ;;  %s1270_s0 = inlined_call_operand.vmem [shape: f32[8,32], index: 0, kind: input, shape index: {}]   ;;  %s1271_s1 = inlined_call_operand.vmem [shape: f32[32,128], index: 1, kind: input, shape index: {}]   ;;  %s1272_s2 = inlined_call_operand.vmem [shape: f32[1,128], index: 2, kind: input, shape index: {}]   ;;  %s1273_s3 = inlined_call_operand.vmem [shape: f32[128,896], index: 3, kind: input, shape index: {}]   ;;  %s1274_s4 = inlined_call_operand.vmem [shape: f32[1,896], index: 4, kind: input, shape index: {}]   ;;  %s1275_s5 = inlined_call_operand.hbm [shape: f32[8,896], index: 5, kind: output, shape index: {}]  }
   0x1   :  { %v22_v0 = vld [vmem:[%s1271_s1] sm:$0xff]  ;;  %v23_v1 = vld [vmem:[%s1271_s1 + $0x8] sm:$0xff]  ;;  %v24_v2 = vld [vmem:[%s1271_s1 + $0x10] sm:$0xff]  ;;  %672 = vmatprep.subr.bf16.mxu0 %v844_v3  ;;  %634 = vmatprep.mubr.msk.f32.mxu0 %vm845_vm0, %v846_v6 }
   0x2   :  { %v673_v4 = vpack.c.bf16 %v23_v1, %v22_v0  ;;  %v25_v5 = vld [vmem:[%s1271_s1 + $0x18] sm:$0xff]  ;;  %334 = vmatprep.mubr.f32.mxu1 %v846_v6 }
   0x3   :  { %10 = vsyncpa [#allocation3], 0  ;;  %v676_v7 = vpack.c.bf16 %v25_v5, %v24_v2  ;;  %v21_v8 = vld [vmem:[%s1270_s0] sm:$0xff]  ;;  %vm33_vm1 = vcmask 261120   ;;  %v122_v9 = vld [vmem:[%s1273_s3 + $0x8] sm:$0xff] }
   0x4   :  { %674 = vmatpush3.bf16.msra.mxu0 %v673_v4  ;;  %v129_v10 = vld [vmem:[%s1273_s3 + $0x40] sm:$0xff]  ;;  %v124_v11 = vld [vmem:[%s1273_s3 + $0x18] sm:$0xff]  ;;  %v131_v13 = vld [vmem:[%s1273_s3 + $0x50] sm:$0xff] }
   0x5   :  { %675 = vmatprep.subr.bf16.mxu0 %v844_v3  ;;  %v678_v12 = vpack.c.bf16 %v129_v10, %v122_v9  ;;  %v121_v14 = vld [vmem:[%s1273_s3] sm:$0xff]  ;;  %v128_v15 = vld [vmem:[%s1273_s3 + $0x38] sm:$0xff]  ;;  %v710_v16 = vpack.c.bf16 %v131_v13, %v124_v11  ;;  %v123_v18 = vld [vmem:[%s1273_s3 + $0x10] sm:$0xff] }
   0x6   :  { %v680_v17 = vpack.c.bf16 %v128_v15, %v121_v14  ;;  %v130_v19 = vld [vmem:[%s1273_s3 + $0x48] sm:$0xff]  ;;  %v136_v21 = vld [vmem:[%s1273_s3 + $0x78] sm:$0xff]  ;;  %v143_v22 = vld [vmem:[%s1273_s3 + $0xb0] sm:$0xff] }
   0x7   :  { %679 = vmatprep.subr.bf16.mxu1 %v678_v12  ;;  %v712_v20 = vpack.c.bf16 %v130_v19, %v123_v18  ;;  %v138_v23 = vld [vmem:[%s1273_s3 + $0x88] sm:$0xff]  ;;  %v682_v24 = vpack.c.bf16 %v143_v22, %v136_v21  ;;  %v145_v25 = vld [vmem:[%s1273_s3 + $0xc0] sm:$0xff]  ;;  %v135_v26 = vld [vmem:[%s1273_s3 + $0x70] sm:$0xff] }
   0x8   :  { %677 = vmatpush3.bf16.msra.mxu0 %v676_v7  ;;  %681 = vmatpush1.bf16.msra.mxu1 %v680_v17  ;;  %v142_v27 = vld [vmem:[%s1273_s3 + $0xa8] sm:$0xff]  ;;  %v714_v28 = vpack.c.bf16 %v145_v25, %v138_v23  ;;  %v137_v30 = vld [vmem:[%s1273_s3 + $0x80] sm:$0xff]  ;;  %v144_v31 = vld [vmem:[%s1273_s3 + $0xb8] sm:$0xff] }
   0x9   :  { %711 = vmatprep.subr.bf16.mxu0 %v710_v16  ;;  %v684_v29 = vpack.c.bf16 %v142_v27, %v135_v26  ;;  %683 = vmatprep.subr.bf16.mxu1 %v682_v24  ;;  %v716_v32 = vpack.c.bf16 %v144_v31, %v137_v30  ;;  %v150_v33 = vld [vmem:[%s1273_s3 + $0xe8] sm:$0xff]  ;;  %v157_v34 = vld [vmem:[%s1273_s3 + $0x120] sm:$0xff]  ;;  %v152_v35 = vld [vmem:[%s1273_s3 + $0xf8] sm:$0xff] }
   0xa   :  { %v686_v36 = vpack.c.bf16 %v157_v34, %v150_v33  ;;  %v159_v37 = vld [vmem:[%s1273_s3 + $0x130] sm:$0xff]  ;;  %v149_v38 = vld [vmem:[%s1273_s3 + $0xe0] sm:$0xff]  ;;  %v156_v39 = vld [vmem:[%s1273_s3 + $0x118] sm:$0xff] }
   0xb   :  { %635 = vmatmul.mubr.msk.f32.vlgmr.msra.gmra.mrb[0].mxu0 %vm33_vm1, %v21_v8  ;;  %v718_v40 = vpack.c.bf16 %v159_v37, %v152_v35  ;;  %v688_v41 = vpack.c.bf16 %v156_v39, %v149_v38  ;;  %v151_v42 = vld [vmem:[%s1273_s3 + $0xf0] sm:$0xff]  ;;  %v158_v43 = vld [vmem:[%s1273_s3 + $0x128] sm:$0xff]  ;;  %v164_v44 = vld [vmem:[%s1273_s3 + $0x158] sm:$0xff] }
   0xc   :  { %405 = vmatprep.mubr.f32.mxu0 %v846_v6  ;;  %713 = vmatpush1.bf16.msra.mxu0 %v712_v20  ;;  %v720_v45 = vpack.c.bf16 %v158_v43, %v151_v42  ;;  %v171_v46 = vld [vmem:[%s1273_s3 + $0x190] sm:$0xff]  ;;  %v166_v47 = vld [vmem:[%s1273_s3 + $0x168] sm:$0xff]  ;;  %v173_v48 = vld [vmem:[%s1273_s3 + $0x1a0] sm:$0xff] }
   0xd   :  { %715 = vmatprep.subr.bf16.mxu0 %v714_v28  ;;  %685 = vmatpush1.bf16.msra.mxu1 %v684_v29  ;;  %v690_v49 = vpack.c.bf16 %v171_v46, %v164_v44  ;;  %v722_v50 = vpack.c.bf16 %v173_v48, %v166_v47  ;;  %v163_v51 = vld [vmem:[%s1273_s3 + $0x150] sm:$0xff]  ;;  %v170_v52 = vld [vmem:[%s1273_s3 + $0x188] sm:$0xff]  ;;  %v165_v53 = vld [vmem:[%s1273_s3 + $0x160] sm:$0xff] }
   0xe   :  { %687 = vmatprep.subr.bf16.mxu1 %v686_v36  ;;  %v692_v54 = vpack.c.bf16 %v170_v52, %v163_v51  ;;  %v172_v55 = vld [vmem:[%s1273_s3 + $0x198] sm:$0xff]  ;;  %v178_v56 = vld [vmem:[%s1273_s3 + $0x1c8] sm:$0xff]  ;;  %v185_v57 = vld [vmem:[%s1273_s3 + $0x200] sm:$0xff] }
   0xf   :  { %v724_v58 = vpack.c.bf16 %v172_v55, %v165_v53  ;;  %v694_v59 = vpack.c.bf16 %v185_v57, %v178_v56  ;;  %v180_v60 = vld [vmem:[%s1273_s3 + $0x1d8] sm:$0xff]  ;;  %v187_v61 = vld [vmem:[%s1273_s3 + $0x210] sm:$0xff]  ;;  %v177_v62 = vld [vmem:[%s1273_s3 + $0x1c0] sm:$0xff] }
  0x10   :  { %717 = vmatpush1.bf16.msra.mxu0 %v716_v32  ;;  %v726_v63 = vpack.c.bf16 %v187_v61, %v180_v60  ;;  %v184_v0 = vld [vmem:[%s1273_s3 + $0x1f8] sm:$0xff]  ;;  %v179_v1 = vld [vmem:[%s1273_s3 + $0x1d0] sm:$0xff]  ;;  %v186_v2 = vld [vmem:[%s1273_s3 + $0x208] sm:$0xff] }
  0x11   :  { %719 = vmatprep.subr.bf16.mxu0 %v718_v40  ;;  %689 = vmatpush1.bf16.msra.mxu1 %v688_v41  ;;  %v696_v4 = vpack.c.bf16 %v184_v0, %v177_v62  ;;  %v192_v5 = vld [vmem:[%s1273_s3 + $0x238] sm:$0xff]  ;;  %v199_v7 = vld [vmem:[%s1273_s3 + $0x270] sm:$0xff]  ;;  %v194_v8 = vld [vmem:[%s1273_s3 + $0x248] sm:$0xff]  ;;  %v728_v9 = vpack.c.bf16 %v186_v2, %v179_v1 }
  0x12   :  { %691 = vmatprep.subr.bf16.mxu1 %v690_v49  ;;  %v698_v10 = vpack.c.bf16 %v199_v7, %v192_v5  ;;  %v201_v11 = vld [vmem:[%s1273_s3 + $0x280] sm:$0xff]  ;;  %v191_v12 = vld [vmem:[%s1273_s3 + $0x230] sm:$0xff]  ;;  %v198_v13 = vld [vmem:[%s1273_s3 + $0x268] sm:$0xff] }
  0x13   :  { %v730_v14 = vpack.c.bf16 %v201_v11, %v194_v8  ;;  %v193_v15 = vld [vmem:[%s1273_s3 + $0x240] sm:$0xff]  ;;  %v200_v16 = vld [vmem:[%s1273_s3 + $0x278] sm:$0xff]  ;;  %v206_v17 = vld [vmem:[%s1273_s3 + $0x2a8] sm:$0xff]  ;;  %v700_v21 = vpack.c.bf16 %v198_v13, %v191_v12 }
  0x14   :  { %721 = vmatpush1.bf16.msra.mxu0 %v720_v45  ;;  %v213_v18 = vld [vmem:[%s1273_s3 + $0x2e0] sm:$0xff]  ;;  %v208_v19 = vld [vmem:[%s1273_s3 + $0x2b8] sm:$0xff]  ;;  %v215_v20 = vld [vmem:[%s1273_s3 + $0x2f0] sm:$0xff]  ;;  %v732_v22 = vpack.c.bf16 %v200_v16, %v193_v15 }
  0x15   :  { %723 = vmatprep.subr.bf16.mxu0 %v722_v50  ;;  %693 = vmatpush1.bf16.msra.mxu1 %v692_v54  ;;  %v702_v23 = vpack.c.bf16 %v213_v18, %v206_v17  ;;  %v205_v24 = vld [vmem:[%s1273_s3 + $0x2a0] sm:$0xff]  ;;  %v212_v25 = vld [vmem:[%s1273_s3 + $0x2d8] sm:$0xff]  ;;  %v207_v26 = vld [vmem:[%s1273_s3 + $0x2b0] sm:$0xff]  ;;  %v734_v27 = vpack.c.bf16 %v215_v20, %v208_v19 }
  0x16   :  { %695 = vmatprep.subr.bf16.mxu1 %v694_v59  ;;  %v214_v28 = vld [vmem:[%s1273_s3 + $0x2e8] sm:$0xff]  ;;  %v220_v29 = vld [vmem:[%s1273_s3 + $0x318] sm:$0xff]  ;;  %v227_v30 = vld [vmem:[%s1273_s3 + $0x350] sm:$0xff]  ;;  %v704_v33 = vpack.c.bf16 %v212_v25, %v205_v24 }
  0x17   :  { %v222_v31 = vld [vmem:[%s1273_s3 + $0x328] sm:$0xff]  ;;  %v229_v32 = vld [vmem:[%s1273_s3 + $0x360] sm:$0xff]  ;;  %v736_v34 = vpack.c.bf16 %v214_v28, %v207_v26  ;;  %v706_v35 = vpack.c.bf16 %v227_v30, %v220_v29  ;;  %v219_v36 = vld [vmem:[%s1273_s3 + $0x310] sm:$0xff] }
  0x18   :  { %725 = vmatpush1.bf16.msra.mxu0 %v724_v58  ;;  %v226_v37 = vld [vmem:[%s1273_s3 + $0x348] sm:$0xff]  ;;  %v221_v38 = vld [vmem:[%s1273_s3 + $0x320] sm:$0xff]  ;;  %v738_v39 = vpack.c.bf16 %v229_v32, %v222_v31  ;;  %v228_v40 = vld [vmem:[%s1273_s3 + $0x358] sm:$0xff] }
  0x19   :  { %727 = vmatprep.subr.bf16.mxu0 %v726_v63  ;;  %697 = vmatpush1.bf16.msra.mxu1 %v696_v4  ;;  %v126_v41 = vld [vmem:[%s1273_s3 + $0x28] sm:$0xff]  ;;  %v133_v42 = vld [vmem:[%s1273_s3 + $0x60] sm:$0xff]  ;;  %v708_v43 = vpack.c.bf16 %v226_v37, %v219_v36  ;;  %v740_v44 = vpack.c.bf16 %v228_v40, %v221_v38  ;;  %v132_v58 = vld [vmem:[%s1273_s3 + $0x58] sm:$0xff] }
  0x1a   :  { %699 = vmatprep.subr.bf16.mxu1 %v698_v10  ;;  %v742_v45 = vpack.c.bf16 %v133_v42, %v126_v41  ;;  %v602_v46 = vld [vmem:[%s1272_s2] ss:$0 sm:$0xff]  ;;  %v127_v59 = vld [vmem:[%s1273_s3 + $0x30] sm:$0xff]  ;;  %v134_v60 = vld [vmem:[%s1273_s3 + $0x68] sm:$0xff] }
  0x1b   :  { %v125_v57 = vld [vmem:[%s1273_s3 + $0x20] sm:$0xff]  ;;  %v140_v62 = vld [vmem:[%s1273_s3 + $0x98] sm:$0xff]  ;;  %v147_v63 = vld [vmem:[%s1273_s3 + $0xd0] sm:$0xff]  ;;  %v775_v4 = vpack.c.bf16 %v134_v60, %v127_v59 }
  0x1c   :  { %729 = vmatpush1.bf16.msra.mxu0 %v728_v9  ;;  %v744_v2 = vpack.c.bf16 %v132_v58, %v125_v57  ;;  %v139_v5 = vld [vmem:[%s1273_s3 + $0x90] sm:$0xff]  ;;  %v746_v8 = vpack.c.bf16 %v147_v63, %v140_v62  ;;  %v146_v9 = vld [vmem:[%s1273_s3 + $0xc8] sm:$0xff]  ;;  %v141_v10 = vld [vmem:[%s1273_s3 + $0xa0] sm:$0xff] }
  0x1d   :  { %731 = vmatprep.subr.bf16.mxu0 %v730_v14  ;;  %701 = vmatpush1.bf16.msra.mxu1 %v700_v21  ;;  %v148_v11 = vld [vmem:[%s1273_s3 + $0xd8] sm:$0xff]  ;;  %v154_v13 = vld [vmem:[%s1273_s3 + $0x108] sm:$0xff]  ;;  %v161_v14 = vld [vmem:[%s1273_s3 + $0x140] sm:$0xff]  ;;  %v748_v15 = vpack.c.bf16 %v146_v9, %v139_v5  ;;  %v235_v5 = vlaneseq }
  0x1e   :  { %703 = vmatprep.subr.bf16.mxu1 %v702_v23  ;;  %v778_v16 = vpack.c.bf16 %v148_v11, %v141_v10  ;;  %v153_v17 = vld [vmem:[%s1273_s3 + $0x100] sm:$0xff]  ;;  %v750_v18 = vpack.c.bf16 %v161_v14, %v154_v13  ;;  %v160_v19 = vld [vmem:[%s1273_s3 + $0x138] sm:$0xff]  ;;  %v155_v20 = vld [vmem:[%s1273_s3 + $0x110] sm:$0xff] }
  0x1f   :  { %v162_v21 = vld [vmem:[%s1273_s3 + $0x148] sm:$0xff]  ;;  %v175_v23 = vld [vmem:[%s1273_s3 + $0x1b0] sm:$0xff]  ;;  %v752_v24 = vpack.c.bf16 %v160_v19, %v153_v17  ;;  %v176_v29 = vld [vmem:[%s1273_s3 + $0x1b8] sm:$0xff] }
  0x20   :  { %733 = vmatpush1.bf16.msra.mxu0 %v732_v22  ;;  %v168_v22 = vld [vmem:[%s1273_s3 + $0x178] sm:$0xff]  ;;  %v781_v25 = vpack.c.bf16 %v162_v21, %v155_v20  ;;  %v167_v26 = vld [vmem:[%s1273_s3 + $0x170] sm:$0xff]  ;;  %v174_v28 = vld [vmem:[%s1273_s3 + $0x1a8] sm:$0xff] }
  0x21   :  { %735 = vmatprep.subr.bf16.mxu0 %v734_v27  ;;  %705 = vmatpush1.bf16.msra.mxu1 %v704_v33  ;;  %v754_v27 = vpack.c.bf16 %v175_v23, %v168_v22  ;;  %v182_v30 = vld [vmem:[%s1273_s3 + $0x1e8] sm:$0xff]  ;;  %v189_v31 = vld [vmem:[%s1273_s3 + $0x220] sm:$0xff]  ;;  %v756_v32 = vpack.c.bf16 %v174_v28, %v167_v26  ;;  %v188_v36 = vld [vmem:[%s1273_s3 + $0x218] sm:$0xff] }
  0x22   :  { %707 = vmatprep.subr.bf16.mxu1 %v706_v35  ;;  %v758_v35 = vpack.c.bf16 %v189_v31, %v182_v30  ;;  %v183_v37 = vld [vmem:[%s1273_s3 + $0x1f0] sm:$0xff]  ;;  %v190_v38 = vld [vmem:[%s1273_s3 + $0x228] sm:$0xff]  ;;  %v224_v57 = vld [vmem:[%s1273_s3 + $0x338] sm:$0xff] }
  0x23   :  { %v203_v40 = vld [vmem:[%s1273_s3 + $0x290] sm:$0xff]  ;;  %v787_v42 = vpack.c.bf16 %v190_v38, %v183_v37  ;;  %v230_v63 = vld [vmem:[%s1273_s3 + $0x368] sm:$0xff]  ;;  %v233_v10 = vld [vmem:[%s1274_s4] sm:$0xff] }
  0x24   :  { %737 = vmatpush1.bf16.msra.mxu0 %v736_v34  ;;  %v181_v34 = vld [vmem:[%s1273_s3 + $0x1e0] sm:$0xff]  ;;  %v231_v58 = vld [vmem:[%s1273_s3 + $0x370] sm:$0xff] }
  0x25   :  { %739 = vmatprep.subr.bf16.mxu0 %v738_v39  ;;  %709 = vmatpush1.bf16.msra.mxu1 %v708_v43  ;;  %v196_v39 = vld [vmem:[%s1273_s3 + $0x258] sm:$0xff]  ;;  %v760_v41 = vpack.c.bf16 %v188_v36, %v181_v34  ;;  %v195_v43 = vld [vmem:[%s1273_s3 + $0x250] sm:$0xff]  ;;  %v770_v62 = vpack.c.bf16 %v231_v58, %v224_v57 }
  0x26   :  { %743 = vmatprep.subr.bf16.mxu1 %v742_v45  ;;  %v202_v45 = vld [vmem:[%s1273_s3 + $0x288] sm:$0xff] }
  0x28   :  { %741 = vmatpush1.bf16.msra.mxu0 %v740_v44  ;;  %v762_v44 = vpack.c.bf16 %v203_v40, %v196_v39 }
  0x29   :  { %774 = vmatprep.subr.bf16.mxu0 %v844_v3 }
  0xde   :  { %v103_v47 = vpop.f32.mrb[0].mxu0 }
  0xdf   :  { %v104_v48 = vadd.f32 %v602_v46, %v103_v47  ;;  %v636_v49 = vpop.f32.mrb[1].mxu0  ;;  %v197_v46 = vld [vmem:[%s1273_s3 + $0x260] sm:$0xff]  ;;  %v204_v47 = vld [vmem:[%s1273_s3 + $0x298] sm:$0xff] }
  0xe0   :  { %v217_v49 = vld [vmem:[%s1273_s3 + $0x300] sm:$0xff] }
  0xe1   :  { %v108_v50 = vmin.f32 %v104_v48, 20.0  ;;  %vm107_vm3 = vcmp.gt.f32.partialorder %v104_v48, 20.0 }
  0xe3   :  { %v109_v51 = vmul.f32 1.442695, %v108_v50  ;;  %v764_v50 = vpack.c.bf16 %v202_v45, %v195_v43 }
  0xe5   :  { %802 = vpow2.f32 %v109_v51  ;;  %v790_v51 = vpack.c.bf16 %v204_v47, %v197_v46 }
  0xef   :  { %v803_v52 = vpop.eup %802 }
  0xf0   :  { %v111_v53 = vadd.f32 1.0, %v803_v52  ;;  %v114_v54 = vmul.f32 -0.5, %v803_v52  ;;  %v117_v56 = vand.u32 2147483647, %v803_v52 }
  0xf2   :  { %804 = vlog2.f32 %v111_v53  ;;  %v115_v55 = vadd.f32 1.0, %v114_v54  ;;  %vm118_vm2 = vcmp.lt.f32.partialorder %v117_v56, 0.0004427343  ;;  %v216_v54 = vld [vmem:[%s1273_s3 + $0x2f8] sm:$0xff]  ;;  %v218_v56 = vld [vmem:[%s1273_s3 + $0x308] sm:$0xff] }
  0xf4   :  { %v116_v1 = vmul.f32 %v803_v52, %v115_v55  ;;  %v209_v52 = vld [vmem:[%s1273_s3 + $0x2c0] sm:$0xff]  ;;  %v211_v55 = vld [vmem:[%s1273_s3 + $0x2d0] sm:$0xff] }
  0xf5   :  { %v768_v59 = vpack.c.bf16 %v216_v54, %v209_v52  ;;  %v793_v60 = vpack.c.bf16 %v218_v56, %v211_v55 }
  0xfc   :  { %v805_v61 = vpop.eup %804 }
  0xfd   :  { %v113_v0 = vmul.f32 0.6931472, %v805_v61  ;;  %v223_v61 = vld [vmem:[%s1273_s3 + $0x330] sm:$0xff] }
  0xff   :  { %v119_v7 = vsel %vm118_vm2, %v116_v1, %v113_v0  ;;  %v225_v0 = vld [vmem:[%s1273_s3 + $0x340] sm:$0xff]  ;;  %v232_v1 = vld [vmem:[%s1273_s3 + $0x378] sm:$0xff] }
 0x100   :  { %v1131_v12 = vsel %vm107_vm3, %v104_v48, %v119_v7  ;;  %v210_v48 = vld [vmem:[%s1273_s3 + $0x2c8] sm:$0xff]  ;;  %v236_v7 = vshrl.u32 %v235_v5, 7 }
 0x101   :  { %335 = vmatmul.mubr.f32.vlgmr.msra.gmra.mrb[0].mxu1 %v1131_v12  ;;  %406 = vmatmul.mubr.f32.vlgmr.msra.gmra.mrb[2].mxu0 %v1131_v12  ;;  %v766_v53 = vpack.c.bf16 %v217_v49, %v210_v48 }
 0x102   :  { %745 = vmatpush1.bf16.msra.mxu1 %v744_v2  ;;  %776 = vmatpush3.bf16.msra.mxu0 %v775_v4  ;;  %v772_v2 = vpack.c.bf16 %v230_v63, %v223_v61  ;;  %v796_v4 = vpack.c.bf16 %v232_v1, %v225_v0  ;;  %v245_v9 = vsub.s32 2, %v236_v7  ;;  %v241_v11 = vsub.s32 1, %v236_v7 }
 0x103   :  { %747 = vmatprep.subr.bf16.mxu1 %v746_v8  ;;  %777 = vmatprep.subr.bf16.mxu0 %v844_v3  ;;  %v237_v8 = vsub.s32 0, %v236_v7  ;;  %v249_v13 = vsub.s32 3, %v236_v7  ;;  %v253_v39 = vsub.s32 4, %v236_v7  ;;  %v261_v40 = vsub.s32 6, %v236_v7 }
 0x104   :  { %476 = vmatprep.mubr.f32.mxu1 %v846_v6  ;;  %669 = vmatprep.mubr.msk.f32.mxu0 %vm845_vm0, %v846_v6  ;;  %v169_v6 = vld [vmem:[%s1273_s3 + $0x180] sm:$0xff]  ;;  %s847_s3 = smov [#allocation2]  }
 0x105   :  { %v784_v33 = vpack.c.bf16 %v176_v29, %v169_v6  ;;  %v238_v14 = vrot.slane %v233_v10, %v237_v8  ;;  %v262_v43 = vrot.slane %v233_v10, %v261_v40  ;;  %s594_s4 = sshll.u32 %s847_s3, 4  ;;  %s595_s4 = int_to_ptr.vmem [resolvable:$true] %s594_s4 }
 0x106   :  { %749 = vmatpush1.bf16.msra.mxu1 %v748_v15  ;;  %779 = vmatpush3.bf16.msra.mxu0 %v778_v16  ;;  %v246_v15 = vrot.slane %v233_v10, %v245_v9  ;;  %v242_v16 = vrot.slane %v233_v10, %v241_v11  ;;  %s820_s0 = scalar_lea.vmem %s595_s4, 896  ;;  %p825_p1 = scmp.lt.s32.totalorder %s595_s4, %s595_s4 }
 0x107   :  { %751 = vmatprep.subr.bf16.mxu1 %v750_v18  ;;  %780 = vmatprep.subr.bf16.mxu0 %v844_v3  ;;  %p821_p0 = scmp.ne.s32.totalorder %s595_s4, %s820_s0  ;;  %p826_p2 = scmp.lt.s32.totalorder %s820_s0, %s820_s0 }
 0x109   :  { %p827_p3 = por %p826_p2, %p825_p1 }
 0x10a   :  { %753 = vmatpush1.bf16.msra.mxu1 %v752_v24  ;;  %782 = vmatpush3.bf16.msra.mxu0 %v781_v25 }
 0x10b   :  { %755 = vmatprep.subr.bf16.mxu1 %v754_v27  ;;  %783 = vmatprep.subr.bf16.mxu0 %v844_v3  ;;  %p828_p4 = pnand %p827_p3, %p821_p0 }
 0x10e   :  { %757 = vmatpush1.bf16.msra.mxu1 %v756_v32  ;;  %785 = vmatpush3.bf16.msra.mxu0 %v784_v33 }
 0x10f   :  { %759 = vmatprep.subr.bf16.mxu1 %v758_v35  ;;  %786 = vmatprep.subr.bf16.mxu0 %v844_v3 }
 0x112   :  { %761 = vmatpush1.bf16.msra.mxu1 %v760_v41  ;;  %788 = vmatpush3.bf16.msra.mxu0 %v787_v42  ;;  %v257_v41 = vsub.s32 5, %v236_v7  ;;  %v254_v42 = vrot.slane %v233_v10, %v253_v39 }
 0x113   :  { %763 = vmatprep.subr.bf16.mxu1 %v762_v44  ;;  %789 = vmatprep.subr.bf16.mxu0 %v844_v3 }
 0x114   :  { %v258_v44 = vrot.slane %v233_v10, %v257_v41 }
 0x116   :  { %765 = vmatpush1.bf16.msra.mxu1 %v764_v50  ;;  %791 = vmatpush3.bf16.msra.mxu0 %v790_v51 }
 0x117   :  { %767 = vmatprep.subr.bf16.mxu1 %v766_v53  ;;  %792 = vmatprep.subr.bf16.mxu0 %v844_v3 }
 0x11a   :  { %769 = vmatpush1.bf16.msra.mxu1 %v768_v59  ;;  %794 = vmatpush3.bf16.msra.mxu0 %v793_v60 }
 0x11b   :  { %771 = vmatprep.subr.bf16.mxu1 %v770_v62  ;;  %795 = vmatprep.subr.bf16.mxu0 %v844_v3  ;;  %v250_v3 = vrot.slane %v233_v10, %v249_v13 }
 0x11e   :  { %773 = vmatpush1.bf16.msra.mxu1 %v772_v2  ;;  %797 = vmatpush3.bf16.msra.mxu0 %v796_v4 }
 0x121   :  { %477 = vmatmul.mubr.f32.vlgmr.msra.gmra.mrb[2].mxu1 %v1131_v12  ;;  %670 = vmatmul.mubr.f32.vlgmr.msra.gmra.mrb[4].mxu0 %v1131_v12 }
 0x1d4   :  { %v336_v17 = vpop.f32.mrb[0].mxu1  ;;  %v407_v18 = vpop.f32.mrb[2].mxu0 }
 0x1d5   :  { %v337_v19 = vadd.f32 %v336_v17, %v238_v14  ;;  %v408_v20 = vadd.f32 %v407_v18, %v246_v15  ;;  %v338_v21 = vpop.f32.mrb[1].mxu1  ;;  %v409_v12 = vpop.f32.mrb[3].mxu0 }
 0x1d6   :  { %v339_v22 = vadd.f32 %v338_v21, %v242_v16  ;;  %v410_v23 = vadd.f32 %v409_v12, %v250_v3 }
 0x1d7   :  { %v553_v24 = vmul.f32 0.5, %v337_v19  ;;  %v555_v25 = vmul.f32 0.5, %v408_v20 }
 0x1d8   :  { %v554_v26 = vmul.f32 0.5, %v339_v22  ;;  %v556_v27 = vmul.f32 0.5, %v410_v23 }
 0x1d9   :  { %806 = vtanh.f32 %v553_v24 }
 0x1da   :  { %808 = vtanh.f32 %v555_v25 }
 0x1db   :  { %810 = vtanh.f32 %v554_v26 }
 0x1dc   :  { %812 = vtanh.f32 %v556_v27 }
 0x1e3   :  { %v807_v28 = vpop.eup %806 }
 0x1e4   :  { %v809_v6 = vpop.eup %808  ;;  %v567_v29 = vadd.f32 1.0, %v807_v28 }
 0x1e5   :  { %v811_v30 = vpop.eup %810  ;;  %v569_v31 = vadd.f32 1.0, %v809_v6 }
 0x1e6   :  { %v813_v32 = vpop.eup %812  ;;  %v574_v33 = vmul.f32 0.5, %v567_v29  ;;  %v568_v34 = vadd.f32 1.0, %v811_v30 }
 0x1e7   :  { %v576_v35 = vmul.f32 0.5, %v569_v31  ;;  %v570_v36 = vadd.f32 1.0, %v813_v32 }
 0x1e8   :  { %581 = vst [vmem:[#allocation2] sm:$0xff] %v574_v33  ;;  %v575_v37 = vmul.f32 0.5, %v568_v34 }
 0x1e9   :  { %583 = vst [vmem:[#allocation2 + $0x10] sm:$0xff] %v576_v35  ;;  %v577_v38 = vmul.f32 0.5, %v570_v36 }
 0x1ea   :  { %582 = vst [vmem:[#allocation2 + $0x8] sm:$0xff] %v575_v37 }
 0x1eb   :  { %584 = vst [vmem:[#allocation2 + $0x18] sm:$0xff] %v577_v38 }
 0x1f4   :  { %v478_v45 = vpop.f32.mrb[2].mxu1  ;;  %v549_v46 = vpop.f32.mrb[4].mxu0 }
 0x1f5   :  { %v479_v47 = vadd.f32 %v478_v45, %v254_v42  ;;  %v550_v48 = vadd.f32 %v549_v46, %v262_v43  ;;  %v480_v49 = vpop.f32.mrb[3].mxu1  ;;  %v671_v50 = vpop.f32.mrb[5].mxu0 }
 0x1f6   :  { %v481_v51 = vadd.f32 %v480_v49, %v258_v44 }
 0x1f7   :  { %v557_v52 = vmul.f32 0.5, %v479_v47  ;;  %v559_v53 = vmul.f32 0.5, %v550_v48 }
 0x1f8   :  { %v558_v54 = vmul.f32 0.5, %v481_v51 }
 0x1f9   :  { %814 = vtanh.f32 %v557_v52 }
 0x1fa   :  { %816 = vtanh.f32 %v559_v53 }
 0x1fb   :  { %818 = vtanh.f32 %v558_v54 }
 0x203   :  { %v815_v55 = vpop.eup %814 }
 0x204   :  { %v817_v56 = vpop.eup %816  ;;  %v571_v57 = vadd.f32 1.0, %v815_v55 }
 0x205   :  { %v819_v58 = vpop.eup %818  ;;  %v573_v59 = vadd.f32 1.0, %v817_v56 }
 0x206   :  { %v578_v60 = vmul.f32 0.5, %v571_v57  ;;  %v572_v61 = vadd.f32 1.0, %v819_v58 }
 0x207   :  { %v580_v62 = vmul.f32 0.5, %v573_v59 }
 0x208   :  { %585 = vst [vmem:[#allocation2 + $0x20] sm:$0xff] %v578_v60  ;;  %v579_v63 = vmul.f32 0.5, %v572_v61 }
 0x209   :  { %587 = vst [vmem:[#allocation2 + $0x30] sm:$0xff] %v580_v62 }
 0x20a   :  { %586 = vst [vmem:[#allocation2 + $0x28] sm:$0xff] %v579_v63 }
 0x20b   :  { %831 = shalt.err (!%p828_p4)
}
 0x20c   :  { %s832_s12 = scalar_lea.hbm %s1275_s5, 896 }
 0x20d   :  { %p833_p5 = scmp.ne.s32.totalorder %s1275_s5, %s832_s12  ;;  %p836_p6 = scmp.lt.u32.totalorder %s832_s12, %s1275_s5 }
 0x20f   :  { %p838_p7 = pnand %p836_p6, %p833_p5 }
 0x211   :  { %841 = shalt.err (!%p838_p7)
}
 0x212   :  { %597 = dma.vmem_to_hbm [thread:$0]  %s595_s4, 896, %s1275_s5, [#allocation3]  }
 0x213   :  { %842 = dma.done.wait [#allocation3], 896  }
 0x214   :  { %843 = vsyncadd [#allocation3], 4294966400 }
 0x215   :  { %601 = vsyncpa [#allocation3], 1 }

</bundles_post_ra>
